<compile_context>
chip_gen: v5e
topology: v5e:2x2
jax: 0.10.0
libtpu: 0.0.40
codegen_flags: <defaults>
</compile_context>

<pallas_src>
import functools

import jax
import jax.numpy as jnp
from jax.experimental import pallas as pl
from jax.experimental.pallas import tpu as pltpu

_MIB = 1024 * 1024


def _round_up(a, b):
    return ((a + b - 1) // b) * b


def _vmem_capacity_bytes():
    # Per-TensorCore VMEM: 128 MiB on v5e/v6e, 64 MiB on v7x.  Fall back to the
    # smallest (v7x) when the query is unavailable so the budget is always safe.
    try:
        return int(pltpu.get_tpu_info().vmem_capacity_bytes)
    except Exception:
        return 64 * _MIB


# --------------------------------------------------------------------------
# Pallas kernels
# --------------------------------------------------------------------------

def _fold_quant_kernel(wt_ref, sf_ref, out_ref, *, n_levels):
    """BN-fold + symmetric per-tensor fake quantization of the conv weight.

    wt_ref : (Kdim_pad, Cout_pad) f32  weight laid out (dg, kh, kw, Cg, Cout),
                                       zero padded on both axes.
    sf_ref : (1, Cout_pad)        f32  bn.weight / sqrt(bn.running_var + eps).
    out_ref: (Kdim_pad, Cout_pad) compute_dtype, matmul-ready (no relayout).
    """
    w = wt_ref[...] * sf_ref[...]                 # BN folding (padded entries stay 0)
    # per_channel=False symmetric quant:
    #   scale = max(|w|).clamp(1e-8) / (2^(b-1)-1)
    #   q     = clamp(round(w/scale), -2^(b-1), 2^(b-1)-1) * scale
    w_absmax = jnp.max(jnp.abs(w))
    scale = jnp.maximum(w_absmax, 1e-8) / n_levels
    wq = jnp.clip(jnp.round(w / scale), -(n_levels + 1), n_levels) * scale
    out_ref[...] = wq.astype(out_ref.dtype)


def _matmul_bias_kernel(cols_ref, w_ref, b_ref, out_ref):
    """out = cols @ Wq + bias.

    cols_ref: (tm, Kdim_pad)       compute_dtype
    w_ref   : (Kdim_pad, Cout_pad) compute_dtype
    b_ref   : (1, Cout_pad)        f32
    out_ref : (tm, Cout_pad)       out_dtype
    """
    acc = jnp.dot(cols_ref[...], w_ref[...], preferred_element_type=jnp.float32)
    out_ref[...] = (acc + b_ref[...]).astype(out_ref.dtype)


# --------------------------------------------------------------------------
# Wrappers
# --------------------------------------------------------------------------

def fold_and_quantize_weight(weight, scale_factor, weight_bit, deformable_groups,
                             kdim_pad, cout_pad, compute_dtype):
    """weight (Cout, Cin, kh, kw) -> quantized (Kdim_pad, Cout_pad) matmul operand."""
    cout, cin, kh, kw = weight.shape
    dg = deformable_groups
    cg = cin // dg
    kdim = cin * kh * kw
    # (Cout, Cin, kh, kw) -> (dg, kh, kw, Cg, Cout) -> (Kdim, Cout): matches the
    # (group, kernel-pos, channel) column ordering of the im2col matrix, so the
    # kernel output is matmul-ready.  This is a tiny array; arranging it here is cheap.
    w_kc = weight.reshape(cout, dg, cg, kh, kw).transpose(1, 3, 4, 2, 0)
    w_kc = w_kc.reshape(kdim, cout).astype(jnp.float32)
    w_kc = jnp.pad(w_kc, ((0, kdim_pad - kdim), (0, cout_pad - cout)))
    sf = jnp.pad(scale_factor.reshape(1, cout).astype(jnp.float32),
                 ((0, 0), (0, cout_pad - cout)))
    n_levels = 2 ** (weight_bit - 1) - 1
    cap = _vmem_capacity_bytes()
    need = kdim_pad * cout_pad * (4 + 4 + jnp.dtype(compute_dtype).itemsize) + 8 * _MIB
    # TODO(synk): single-block quant kernel assumes the whole (Kdim_pad, Cout_pad)
    # weight fits in VMEM; very large layers need a two-pass absmax+quantize tiling.
    return pl.pallas_call(
        functools.partial(_fold_quant_kernel, n_levels=n_levels),
        out_shape=jax.ShapeDtypeStruct((kdim_pad, cout_pad), compute_dtype),
        compiler_params=pltpu.CompilerParams(
            vmem_limit_bytes=int(min(cap - 2 * _MIB, max(32 * _MIB, need)))),
    )(w_kc, sf)


def deform_im2col(x, offset, kh, kw, stride, padding, dilation, deformable_groups,
                  kdim_pad, compute_dtype):
    """Deformable-conv bilinear sampling (DCNv1 / torchvision semantics) -> im2col.

    XLA glue tuned for TPU:
      * gathers read a compute_dtype (bf16) NHWC copy of x (half the HBM read),
      * x is zero-padded by 1 pixel and rows are pre-paired, so each kernel
        position needs only 2 contiguous row gathers (top/bottom bilinear pair)
        instead of 4 single-corner gathers,
      * output is emitted directly as (B*Hout*Wout, Kdim_pad) in compute_dtype,
        zero-padded on the lane axis to a multiple of 128 (matmul-ready).
    """
    B, Cin, H, W = x.shape
    sh, sw = stride
    ph, pw = padding
    dh, dw = dilation
    dg = deformable_groups
    Cg = Cin // dg
    K = kh * kw
    Hout = (H + 2 * ph - dh * (kh - 1) - 1) // sh + 1
    Wout = (W + 2 * pw - dw * (kw - 1) - 1) // sw + 1
    Hp, Wp = H + 2, W + 2

    # Channels-last, zero-padded by one pixel: bilinear corners at -1 / H / W read
    # explicit zeros, and (x0, x0+1) is always a contiguous row pair.
    x_nhwc = jnp.transpose(x, (0, 2, 3, 1)).astype(compute_dtype)
    xp = jnp.pad(x_nhwc, ((0, 0), (1, 1), (1, 1), (0, 0)))
    xp_flat = xp.reshape(B * Hp * Wp, Cin)
    # Row i of xp_pairs = [row i | row i+1]: one gather fetches both x-corners.
    # x is tiny relative to the kh*kw-expanded cols, so the 2x copy is cheap.
    xp_pairs = jnp.concatenate([xp_flat[:-1], xp_flat[1:]], axis=1)   # (N-1, 2*Cin)

    # Offsets: (B, dg*2*K, Hout, Wout), channel layout (dg, K, (dy, dx)).
    off = offset.reshape(B, dg, K, 2, Hout, Wout)
    dy = jnp.transpose(off[:, :, :, 0], (0, 3, 4, 1, 2)).astype(jnp.float32)  # (B,Ho,Wo,dg,K)
    dx = jnp.transpose(off[:, :, :, 1], (0, 3, 4, 1, 2)).astype(jnp.float32)

    ky = jnp.repeat(jnp.arange(kh), kw)                       # (K,) kernel row
    kx = jnp.tile(jnp.arange(kw), kh)                         # (K,) kernel col
    base_y = (jnp.arange(Hout)[:, None] * sh - ph) + ky[None, :] * dh   # (Hout, K)
    base_x = (jnp.arange(Wout)[:, None] * sw - pw) + kx[None, :] * dw   # (Wout, K)

    py = base_y[None, :, None, None, :].astype(jnp.float32) + dy        # (B,Ho,Wo,dg,K)
    px = base_x[None, None, :, None, :].astype(jnp.float32) + dx

    y0 = jnp.floor(py)
    x0 = jnp.floor(px)
    ly = py - y0
    lx = px - x0
    hy = 1.0 - ly
    hx = 1.0 - lx

    # Zero-padding semantics: a corner contributes iff it lies inside the image.
    vy0 = (y0 >= 0.0) & (y0 <= H - 1.0)
    vy1 = (y0 >= -1.0) & (y0 <= H - 2.0)          # y1 = y0 + 1 inside the image
    vx0 = (x0 >= 0.0) & (x0 <= W - 1.0)
    vx1 = (x0 >= -1.0) & (x0 <= W - 2.0)          # x1 = x0 + 1 inside the image

    w_tl = jnp.where(vy0 & vx0, hy * hx, 0.0)
    w_tr = jnp.where(vy0 & vx1, hy * lx, 0.0)
    w_bl = jnp.where(vy1 & vx0, ly * hx, 0.0)
    w_br = jnp.where(vy1 & vx1, ly * lx, 0.0)

    # Clamp so the 2-wide fetch stays inside the padded image; whenever the clamp
    # actually moves an index, the corresponding weights above are already zero.
    y0c = jnp.clip(y0, -1.0, H - 1.0).astype(jnp.int32)
    x0c = jnp.clip(x0, -1.0, W - 1.0).astype(jnp.int32)

    b_off = (jnp.arange(B, dtype=jnp.int32) * (Hp * Wp))[:, None, None, None, None]
    row_top = b_off + (y0c + 1) * Wp + (x0c + 1)              # flat padded-row index
    row_bot = row_top + Wp

    group_cols = []
    for g in range(dg):
        if dg == 1:
            pairs_g = xp_pairs
        else:
            pairs_g = jnp.concatenate(
                [xp_pairs[:, g * Cg:(g + 1) * Cg],
                 xp_pairs[:, Cin + g * Cg:Cin + (g + 1) * Cg]], axis=1)
        acc = None
        for rows, wl, wr in ((row_top, w_tl, w_tr), (row_bot, w_bl, w_br)):
            idx = rows[:, :, :, g, :].reshape(-1)
            v = jnp.take(pairs_g, idx, axis=0).astype(jnp.float32)
            v = v.reshape(B, Hout, Wout, K, 2, Cg)
            contrib = (v[..., 0, :] * wl[:, :, :, g, :][..., None]
                       + v[..., 1, :] * wr[:, :, :, g, :][..., None])
            acc = contrib if acc is None else acc + contrib
        group_cols.append(acc)                                 # (B,Ho,Wo,K,Cg) f32

    if dg == 1:
        cols = group_cols[0].reshape(B * Hout * Wout, K * Cg)
    else:
        cols = jnp.stack(group_cols, axis=3).reshape(B * Hout * Wout, dg * K * Cg)
    cols = cols.astype(compute_dtype)
    kdim = dg * K * Cg
    if kdim_pad > kdim:
        cols = jnp.pad(cols, ((0, 0), (0, kdim_pad - kdim)))
    return cols, Hout, Wout


def _pick_tile_m(M, kp, cout_pad, cd_bytes, out_bytes, budget):
    """Largest M tile whose pipelined VMEM footprint fits the per-TC budget."""
    def need(tm):
        return (2 * tm * kp * cd_bytes            # cols tile, double-buffered
                + 2 * kp * cout_pad * cd_bytes    # weight (2x: fallback path keeps
                + 2 * cout_pad * 4                #   default double buffering)
                + 2 * tm * cout_pad * out_bytes)  # out tile, double-buffered
    # Prefer >= 2 grid steps (keeps both v7x TensorCores busy, amortizes the
    # ~0.35us per-grid-step overhead with long uninterrupted MXU feeds).
    for tm in (2048, 1024, 512, 256, 128):
        if need(tm) <= budget and M >= 2 * tm:
            return tm, need(tm)
    # Tiny problem (or tight VMEM): one modest tile covering the padded M.
    tm = max(128, min(_round_up(M, 128), 2048))
    while tm > 128 and need(tm) > budget:
        tm -= 128
    return tm, need(tm)


def quant_bn_deform_conv2d(x, offset, params, *, weight_bit=8,
                           stride=(1, 1), padding=(1, 1), dilation=(1, 1),
                           groups=1, deformable_groups=1,
                           compute_dtype=jnp.bfloat16, out_dtype=jnp.float32,
                           out_layout="NCHW"):
    """Forward of QuantBnDeformConv2d (per_channel=False, weight_percentile=False,
    quantize_bias=False, full_precision_flag=False).

    MXU operands (im2col columns + quantized weight) are fed in `compute_dtype`
    (bf16 default: fast MXU path on v5e/v6e/v7x and half the HBM traffic of the
    dominant cols stream) with f32 accumulation; pass jnp.float32 for tighter
    fidelity to the f32 PyTorch reference (bf16 is not bit-exact).
    `out_dtype=jnp.bfloat16` halves output writeback; `out_layout="NHWC"` skips
    the final NCHW relayout when the consumer tolerates it.
    """
    weight = params["conv_weight"]            # (Cout, Cin, kh, kw)
    conv_bias = params["conv_bias"]
    gamma = params["bn_weight"]
    beta = params["bn_bias"]
    rmean = params["bn_running_mean"]
    rvar = params["bn_running_var"]
    eps = params["bn_eps"]

    assert groups == 1  # TODO(synk): grouped (conv groups>1) deformable conv not implemented
    assert out_layout in ("NCHW", "NHWC")
    cout, cin, kh, kw = weight.shape
    assert cin % deformable_groups == 0

    # BN folding factors (tiny per-channel math, plain JAX glue).
    running_std = jnp.sqrt(rvar + eps)
    scale_factor = gamma / running_std
    if conv_bias is None:
        conv_bias = jnp.zeros_like(rmean)
    scaled_bias = (conv_bias - rmean) * scale_factor + beta

    kdim = cin * kh * kw
    kdim_pad = _round_up(kdim, 128)           # lane-dense cols / fully fed MXU K axis
    cout_pad = _round_up(cout, 128)           # lane-dense output / MXU N axis

    # Pallas kernel 1: BN-fold + symmetric fake quantization (matmul-ready layout).
    wq = fold_and_quantize_weight(weight, scale_factor, weight_bit,
                                  deformable_groups, kdim_pad, cout_pad,
                                  compute_dtype)

    # Glue: deformable bilinear pair-gather -> im2col columns (M, Kdim_pad).
    # TODO(synk): fusing this gather into the matmul kernel (building each cols
    # tile in VMEM from an HBM-resident x) would remove the HBM round trip of the
    # ~kh*kw-times-expanded cols matrix, but Mosaic has no general in-kernel
    # dynamic row gather today, so the gather stays in XLA.
    cols, Hout, Wout = deform_im2col(x, offset, kh, kw, stride, padding, dilation,
                                     deformable_groups, kdim_pad, compute_dtype)

    B = x.shape[0]
    M = B * Hout * Wout
    cd_bytes = jnp.dtype(compute_dtype).itemsize
    out_bytes = jnp.dtype(out_dtype).itemsize
    cap = _vmem_capacity_bytes()
    budget = max(cap - 8 * _MIB, 24 * _MIB)   # leave headroom for Mosaic scratch
    tm, tile_bytes = _pick_tile_m(M, kdim_pad, cout_pad, cd_bytes, out_bytes, budget)
    vmem_limit = int(min(cap - 2 * _MIB, max(32 * _MIB, tile_bytes + 8 * _MIB)))

    Mp = _round_up(M, tm)                     # cdiv-style grid: pad ragged last tile
    if Mp != M:
        cols = jnp.pad(cols, ((0, Mp - M), (0, 0)))

    bias_row = jnp.pad(scaled_bias.reshape(1, cout).astype(jnp.float32),
                       ((0, 0), (0, cout_pad - cout)))

    def run(single_buffer_consts):
        # Constant-index operands (weight, bias) are single-buffered to reclaim
        # VMEM headroom (matters most under v7x's 64 MiB per-TC budget).
        const_kw = ({"pipeline_mode": pl.Buffered(1)}
                    if single_buffer_consts else {})
        return pl.pallas_call(
            _matmul_bias_kernel,
            out_shape=jax.ShapeDtypeStruct((Mp, cout_pad), out_dtype),
            grid=(Mp // tm,),
            in_specs=[
                pl.BlockSpec((tm, kdim_pad), lambda i: (i, 0)),
                pl.BlockSpec((kdim_pad, cout_pad), lambda i: (0, 0), **const_kw),
                pl.BlockSpec((1, cout_pad), lambda i: (0, 0), **const_kw),
            ],
            out_specs=pl.BlockSpec((tm, cout_pad), lambda i: (i, 0)),
            compiler_params=pltpu.CompilerParams(
                dimension_semantics=("parallel",),
                vmem_limit_bytes=vmem_limit,
            ),
        )(cols, wq, bias_row)

    try:
        out_mat = run(True)
    except Exception:
        # pl.Buffered(1) unsupported on this JAX/Mosaic build -> default buffering.
        out_mat = run(False)

    # TODO(synk): when Kdim_pad*Cout_pad grows past the VMEM budget, add a K grid
    # axis ('arbitrary', f32 accumulator scratch) instead of one untiled K.
    out_rows = out_mat[:M, :cout]
    if out_layout == "NHWC":
        return out_rows.reshape(B, Hout, Wout, cout)
    # TODO(synk): the NCHW relayout is an output-sized HBM copy; fold it into the
    # kernel (transposed (Cout, tm) output blocks) or use out_layout="NHWC".
    return out_rows.reshape(B, Hout, Wout, cout).transpose(0, 3, 1, 2)


# --------------------------------------------------------------------------
# Demo / smoke test
# --------------------------------------------------------------------------

if __name__ == "__main__":
    key = jax.random.PRNGKey(0)
    B, Cin, H, W = 2, 4, 16, 16
    Cout, kh, kw = 8, 3, 3
    deformable_groups = 1

    k1, k2, k3, k4, k5, k6, k7 = jax.random.split(key, 7)

    x = jax.random.normal(k1, (B, Cin, H, W), dtype=jnp.float32)
    # offsets: (B, dg*2*kh*kw, Hout, Wout); stride=1, pad=1 -> Hout=H, Wout=W
    offset = 0.5 * jax.random.normal(
        k2, (B, deformable_groups * 2 * kh * kw, H, W), dtype=jnp.float32)

    params = {
        "conv_weight": 0.1 * jax.random.normal(k3, (Cout, Cin, kh, kw), dtype=jnp.float32),
        "conv_bias": None,  # conv built without bias -> zeros_like(running_mean) path
        "bn_weight": 0.5 + jax.random.uniform(k4, (Cout,), dtype=jnp.float32),
        "bn_bias": 0.1 * jax.random.normal(k5, (Cout,), dtype=jnp.float32),
        "bn_running_mean": 0.1 * jax.random.normal(k6, (Cout,), dtype=jnp.float32),
        "bn_running_var": 0.5 + jax.random.uniform(k7, (Cout,), dtype=jnp.float32),
        "bn_eps": 1e-5,
    }

    out = quant_bn_deform_conv2d(
        x, offset, params,
        weight_bit=8, stride=(1, 1), padding=(1, 1), dilation=(1, 1),
        groups=1, deformable_groups=deformable_groups)

    out = jax.block_until_ready(out)
    assert out.shape == (B, Cout, H, W), out.shape
    assert bool(jnp.all(jnp.isfinite(out)))
    print("KERNEL_OK")
</pallas_src>

<mosaic_0001>
module attributes {stable_mosaic.version = 11 : i64} {
  func.func @_fold_quant_kernel(%arg0: memref<128x128xf32, #tpu.memory_space<vmem>>, %arg1: memref<1x128xf32, #tpu.memory_space<vmem>>, %arg2: memref<128x128xbf16, #tpu.memory_space<vmem>>) attributes {dimension_semantics = [], scalar_prefetch = 0 : i64, scratch_operands = 0 : i64, tpu.core_type = #tpu.core_type<tc>} {
    %c0 = arith.constant 0 : index
    %c0_0 = arith.constant 0 : index
    %0 = vector.load %arg0[%c0, %c0_0] : memref<128x128xf32, #tpu.memory_space<vmem>>, vector<128x128xf32>
    %c0_1 = arith.constant 0 : index
    %c0_2 = arith.constant 0 : index
    %1 = vector.load %arg1[%c0_1, %c0_2] : memref<1x128xf32, #tpu.memory_space<vmem>>, vector<1x128xf32>
    %2 = vector.broadcast %1 : vector<1x128xf32> to vector<128x128xf32>
    %3 = arith.mulf %0, %2 : vector<128x128xf32>
    %4 = math.absf %3 : vector<128x128xf32>
    %5 = vector.shape_cast %4 : vector<128x128xf32> to vector<1x128x128xf32>
    %cst = arith.constant dense<0xFF800000> : vector<1xf32>
    %6 = vector.multi_reduction <maximumf>, %5, %cst [1, 2] : vector<1x128x128xf32> to vector<1xf32>
    %7 = vector.shape_cast %6 : vector<1xf32> to vector<1x1x1xf32>
    %8 = vector.extract %7[0, 0, 0] : f32 from vector<1x1x1xf32>
    %cst_3 = arith.constant 9.99999993E-9 : f32
    %9 = arith.maximumf %8, %cst_3 : f32
    %cst_4 = arith.constant 1.270000e+02 : f32
    %10 = arith.divf %9, %cst_4 : f32
    %11 = vector.broadcast %10 : f32 to vector<128x128xf32>
    %12 = arith.divf %3, %11 : vector<128x128xf32>
    %13 = math.roundeven %12 : vector<128x128xf32>
    %c-128_i32 = arith.constant -128 : i32
    %c127_i32 = arith.constant 127 : i32
    %14 = arith.sitofp %c-128_i32 : i32 to f32
    %15 = vector.broadcast %14 : f32 to vector<128x128xf32>
    %16 = arith.maximumf %15, %13 : vector<128x128xf32>
    %17 = arith.sitofp %c127_i32 : i32 to f32
    %18 = vector.broadcast %17 : f32 to vector<128x128xf32>
    %19 = arith.minimumf %18, %16 : vector<128x128xf32>
    %20 = vector.broadcast %10 : f32 to vector<128x128xf32>
    %21 = arith.mulf %19, %20 : vector<128x128xf32>
    %22 = arith.truncf %21 : vector<128x128xf32> to vector<128x128xbf16>
    %c0_5 = arith.constant 0 : index
    %c0_6 = arith.constant 0 : index
    %23 = vector.load %arg2[%c0_5, %c0_6] : memref<128x128xbf16, #tpu.memory_space<vmem>>, vector<128x128xbf16>
    tpu.vector_store %arg2[%c0_5, %c0_6], %22 {strides = array<i32>} : memref<128x128xbf16, #tpu.memory_space<vmem>>, vector<128x128xbf16>,
    return
  }
}

</mosaic_0001>

<bundles_post_ra>
// kernel: tpu_custom_call.1
= control target key start
LH: loop header
LB: loop body
LE: loop exit
PB: predicated region body
PF: predicated region fallthrough
CT: control target
= control target key end

     0   :  { %7 = vsyncpa [#allocation3], 0  ;;  %s912_s0 = inlined_call_operand.hbm [shape: f32[128,128], index: 0, kind: input, shape index: {}]   ;;  %s913_s1 = inlined_call_operand.hbm [shape: f32[1,128], index: 1, kind: input, shape index: {}]   ;;  %s914_s2 = inlined_call_operand.hbm [shape: bf16[128,128], index: 2, kind: output, shape index: {}]  }
   0x1   :  { %8 = vsyncpa [#allocation6], 0 }
   0x2   :  { %9 = vsyncpa [#allocation4], 0  ;;  %s14_s11 = sshll.u32 %s912_s0, 4  ;;  %s546_s12 = smov [#allocation2]   ;;  %s15_s11 = int_to_ptr.hbm [resolvable:$true] %s14_s11 }
   0x3   :  { %s16_s13 = sshll.u32 %s546_s12, 4  ;;  %s28_s16 = sshll.u32 %s913_s1, 4  ;;  %s17_s13 = int_to_ptr.vmem [resolvable:$true] %s16_s13  ;;  %s29_s16 = int_to_ptr.hbm [resolvable:$true] %s28_s16 }
   0x4   :  { %s547_s17 = smov 128   ;;  %s548_s18 = smov 8  }
   0x5   :  { %22 = dma.hbm_to_vmem [thread:$0]  %s15_s11, 2048, %s17_s13, [#allocation3], %s547_s17, %s547_s17, %s548_s18  }
   0x6   :  { %s549_s19 = smov [#allocation5]  }
   0x7   :  { %s30_s20 = sshll.u32 %s549_s19, 4  ;;  %s31_s20 = int_to_ptr.vmem [resolvable:$true] %s30_s20 }
   0x8   :  { %33 = dma.hbm_to_vmem [thread:$0]  %s29_s16, 16, %s31_s20, [#allocation6]  }
   0x9   :  { %540 = dma.done.wait [#allocation3], 2048  }
   0xa   :  { %541 = vsyncadd [#allocation3], 4294965248 }
   0xb   :  { %542 = dma.done.wait [#allocation6], 16  }
   0xc   :  { %543 = vsyncadd [#allocation6], 4294967280  ;;  %v42_v0 = vld [vmem:[#allocation2] sm:$0xff]  ;;  %v43_v1 = vld [vmem:[#allocation2 + $0x8] sm:$0xff]  ;;  %s551_s1 = smov 1e-08  }
   0xd   :  { %v44_v2 = vld [vmem:[#allocation2 + $0x10] sm:$0xff]  ;;  %v45_v3 = vld [vmem:[#allocation2 + $0x18] sm:$0xff]  ;;  %v46_v4 = vld [vmem:[#allocation2 + $0x20] sm:$0xff]  ;;  %s552_s24 = smov [#allocation7]   ;;  %s261_s28 = sshll.u32 %s914_s2, 4  ;;  %s262_s28 = int_to_ptr.hbm [resolvable:$true] %s261_s28 }
   0xe   :  { %v47_v5 = vld [vmem:[#allocation2 + $0x28] sm:$0xff]  ;;  %v48_v6 = vld [vmem:[#allocation2 + $0x30] sm:$0xff]  ;;  %v49_v7 = vld [vmem:[#allocation2 + $0x38] sm:$0xff]  ;;  %s259_s25 = sshll.u32 %s552_s24, 4  ;;  %s553_s29 = smov 64   ;;  %s260_s25 = int_to_ptr.vmem [resolvable:$true] %s259_s25 }
   0xf   :  { %v463_v8 = vld [vmem:[#allocation5] ss:$0 sm:$0xff]  ;;  %v51_v10 = vld [vmem:[#allocation2 + $0x48] sm:$0xff]  ;;  %v52_v11 = vld [vmem:[#allocation2 + $0x50] sm:$0xff]  ;;  %s554_s30 = smov 4  }
  0x10   :  { %v50_v9 = vld [vmem:[#allocation2 + $0x40] sm:$0xff]  ;;  %v53_v12 = vld [vmem:[#allocation2 + $0x58] sm:$0xff]  ;;  %v55_v14 = vld [vmem:[#allocation2 + $0x68] sm:$0xff]  ;;  %v576_v15 = vmul.f32 %v463_v8, %v42_v0  ;;  %v578_v16 = vmul.f32 %v463_v8, %v43_v1  ;;  %v580_v17 = vmul.f32 %v463_v8, %v44_v2  ;;  %v582_v19 = vmul.f32 %v463_v8, %v45_v3 }
  0x11   :  { %v54_v13 = vld [vmem:[#allocation2 + $0x60] sm:$0xff]  ;;  %v56_v18 = vld [vmem:[#allocation2 + $0x70] sm:$0xff]  ;;  %v584_v20 = vmul.f32 %v463_v8, %v46_v4  ;;  %v586_v21 = vmul.f32 %v463_v8, %v47_v5  ;;  %v57_v22 = vld [vmem:[#allocation2 + $0x78] sm:$0xff]  ;;  %v588_v23 = vmul.f32 %v463_v8, %v48_v6  ;;  %v590_v24 = vmul.f32 %v463_v8, %v49_v7 }
  0x12   :  { %v592_v25 = vmul.f32 %v463_v8, %v50_v9  ;;  %v594_v26 = vmul.f32 %v463_v8, %v51_v10  ;;  %v596_v27 = vmul.f32 %v463_v8, %v52_v11  ;;  %v598_v28 = vmul.f32 %v463_v8, %v53_v12 }
  0x13   :  { %v600_v29 = vmul.f32 %v463_v8, %v54_v13  ;;  %v602_v30 = vmul.f32 %v463_v8, %v55_v14  ;;  %v604_v31 = vmul.f32 %v463_v8, %v56_v18  ;;  %v78_v32 = vand.u32 2147483647, %v576_v15 }
  0x14   :  { %v79_v33 = vand.u32 2147483647, %v578_v16  ;;  %v80_v34 = vand.u32 2147483647, %v580_v17  ;;  %v609_v35 = vmul.f32 %v463_v8, %v57_v22  ;;  %v81_v36 = vand.u32 2147483647, %v582_v19 }
  0x15   :  { %v82_v37 = vand.u32 2147483647, %v584_v20  ;;  %v83_v38 = vand.u32 2147483647, %v586_v21  ;;  %v84_v39 = vand.u32 2147483647, %v588_v23 }
  0x16   :  { %v85_v40 = vand.u32 2147483647, %v590_v24  ;;  %v86_v41 = vand.u32 2147483647, %v592_v25  ;;  %v87_v42 = vand.u32 2147483647, %v594_v26 }
  0x17   :  { %v88_v43 = vand.u32 2147483647, %v596_v27  ;;  %v89_v44 = vand.u32 2147483647, %v598_v28  ;;  %v94_v45 = vmax.f32 %v78_v32, %v82_v37  ;;  %v90_v46 = vand.u32 2147483647, %v600_v29 }
  0x18   :  { %v91_v47 = vand.u32 2147483647, %v602_v30  ;;  %v92_v48 = vand.u32 2147483647, %v604_v31  ;;  %v95_v49 = vmax.f32 %v79_v33, %v83_v38  ;;  %v93_v50 = vand.u32 2147483647, %v609_v35 }
  0x19   :  { %v96_v51 = vmax.f32 %v80_v34, %v84_v39  ;;  %v97_v52 = vmax.f32 %v81_v36, %v85_v40  ;;  %v98_v53 = vmax.f32 %v94_v45, %v86_v41  ;;  %v550_v0 = vmov 127.0  }
  0x1a   :  { %v99_v54 = vmax.f32 %v95_v49, %v87_v42  ;;  %464 = vrcp.f32 %v550_v0 }
  0x1b   :  { %v100_v55 = vmax.f32 %v96_v51, %v88_v43  ;;  %v101_v56 = vmax.f32 %v97_v52, %v89_v44  ;;  %v102_v57 = vmax.f32 %v98_v53, %v90_v46 }
  0x1c   :  { %v103_v58 = vmax.f32 %v99_v54, %v91_v47 }
  0x1d   :  { %v104_v59 = vmax.f32 %v100_v55, %v92_v48  ;;  %v105_v60 = vmax.f32 %v101_v56, %v93_v50 }
  0x1e   :  { %v106_v61 = vmax.f32 %v102_v57, %v103_v58 }
  0x1f   :  { %v107_v62 = vmax.f32 %v104_v59, %v105_v60 }
  0x20   :  { %v465_v1 = vpop.eup %464 }
  0x21   :  { %v108_v63 = vmax.f32 %v106_v61, %v107_v62  ;;  %v120_v2 = vmul.f32 127.0, %v465_v1  ;;  %vm124_vm0 = vweird.f32 %v465_v1 }
  0x23   :  { %109 = vmax.xlane.f32.xlu0 %v108_v63  ;;  %v121_v3 = vsub.f32 1.0, %v120_v2 }
  0x25   :  { %v122_v7 = vmul.f32 %v465_v1, %v121_v3 }
  0x27   :  { %v123_v10 = vadd.f32 %v465_v1, %v122_v7 }
  0x29   :  { %v125_v13 = vsel %vm124_vm0, %v465_v1, %v123_v10 }
  0x96   :  { %v110_v4 = vpop.xlane.xlu0 %109 }
  0x97   :  { %v111_v5 = vrot.slane %v110_v4, 4 }
  0x99   :  { %v112_v6 = vmax.f32 %v110_v4, %v111_v5 }
  0x9b   :  { %v113_v8 = vrot.slane %v112_v6, 2 }
  0x9d   :  { %v114_v9 = vmax.f32 %v112_v6, %v113_v8 }
  0x9f   :  { %v115_v11 = vrot.slane %v114_v9, 1 }
  0xa1   :  { %v116_v12 = vmax.f32 %v114_v9, %v115_v11 }
  0xa3   :  { %322 = vpush %v116_v12 }
  0xa4   :  { %324 = vpush %v125_v13 }
  0xd4   :  { %s323_s0 = spop %322 }
  0xd5   :  { %s118_s21 = smax.f32 %s551_s1, %s323_s0  ;;  %s325_s22 = spop %324 }
  0xd6   :  { %s127_s23 = smul.f32 %s325_s22, %s118_s21 }
  0xd8   :  { %v624_v14 = vstv %s127_s23 }
  0xd9   :  { %466 = vrcp.f32 %v624_v14  ;;  %v140_v33 = vand.u32 2147483648, %v624_v14  ;;  %v138_v36 = vand.u32 2147483647, %v624_v14  ;;  %vm134_vm2 = vweird.f32 %v624_v14 }
  0xdb   :  { %v141_v38 = vor.u32 1.1754944e-38, %v140_v33  ;;  %vm139_vm4 = vcmp.eq.f32.partialorder %v138_v36, 8.507059e+37 }
  0xdf   :  { %v467_v18 = vpop.eup %466 }
  0xe0   :  { %v130_v22 = vmul.f32 %v467_v18, %v624_v14  ;;  %vm135_vm1 = vweird.f32 %v467_v18 }
  0xe1   :  { %vm136_vm3 = vmor %vm134_vm2, %vm135_vm1 }
  0xe2   :  { %v131_v32 = vsub.f32 1.0, %v130_v22 }
  0xe4   :  { %v132_v34 = vmul.f32 %v467_v18, %v131_v32 }
  0xe6   :  { %v133_v37 = vadd.f32 %v467_v18, %v132_v34 }
  0xe8   :  { %v137_v39 = vsel %vm136_vm3, %v467_v18, %v133_v37 }
  0xe9   :  { %v142_v40 = vsel %vm139_vm4, %v141_v38, %v137_v39 }
  0xea   :  { %v632_v41 = vmul.f32 %v142_v40, %v576_v15  ;;  %v635_v42 = vmul.f32 %v142_v40, %v578_v16  ;;  %v638_v43 = vmul.f32 %v142_v40, %v580_v17  ;;  %v641_v44 = vmul.f32 %v142_v40, %v582_v19 }
  0xeb   :  { %v644_v45 = vmul.f32 %v142_v40, %v584_v20  ;;  %v647_v46 = vmul.f32 %v142_v40, %v586_v21  ;;  %v650_v47 = vmul.f32 %v142_v40, %v588_v23  ;;  %v653_v15 = vmul.f32 %v142_v40, %v590_v24 }
  0xec   :  { %v656_v16 = vmul.f32 %v142_v40, %v592_v25  ;;  %v659_v17 = vmul.f32 %v142_v40, %v594_v26  ;;  %v662_v19 = vmul.f32 %v142_v40, %v596_v27  ;;  %v665_v20 = vmul.f32 %v142_v40, %v598_v28 }
  0xed   :  { %v668_v21 = vmul.f32 %v142_v40, %v600_v29  ;;  %v671_v23 = vmul.f32 %v142_v40, %v602_v30  ;;  %v674_v24 = vmul.f32 %v142_v40, %v604_v31  ;;  %v677_v25 = vmul.f32 %v142_v40, %v609_v35 }
  0xee   :  { %v326_v26 = vand.u32 2147483647, %v632_v41  ;;  %v328_v27 = vcvt.f32.s32 %v632_v41  ;;  %v331_v48 = vand.u32 2147483648, %v632_v41  ;;  %v334_v28 = vand.u32 2147483647, %v635_v42 }
  0xef   :  { %v336_v29 = vcvt.f32.s32 %v635_v42  ;;  %v339_v49 = vand.u32 2147483648, %v635_v42  ;;  %v342_v30 = vand.u32 2147483647, %v638_v43  ;;  %v344_v31 = vcvt.f32.s32 %v638_v43 }
  0xf0   :  { %vm687_vm5 = vcmp.lt.f32.partialorder %v326_v26, 8388608.0  ;;  %v329_v35 = vcvt.s32.f32 %v328_v27  ;;  %vm691_vm6 = vcmp.lt.f32.partialorder %v334_v28, 8388608.0  ;;  %v347_v52 = vand.u32 2147483648, %v638_v43 }
  0xf1   :  { %v337_v53 = vcvt.s32.f32 %v336_v29  ;;  %vm696_vm7 = vcmp.lt.f32.partialorder %v342_v30, 8388608.0  ;;  %v345_v55 = vcvt.s32.f32 %v344_v31  ;;  %v350_v56 = vand.u32 2147483647, %v641_v44 }
  0xf2   :  { %v330_v57 = vand.u32 2147483647, %v329_v35  ;;  %v352_v58 = vcvt.f32.s32 %v641_v44  ;;  %v355_v59 = vand.u32 2147483648, %v641_v44  ;;  %v358_v60 = vand.u32 2147483647, %v644_v45 }
  0xf3   :  { %v338_v61 = vand.u32 2147483647, %v337_v53  ;;  %v346_v62 = vand.u32 2147483647, %v345_v55  ;;  %vm704_vm8 = vcmp.lt.f32.partialorder %v350_v56, 8388608.0  ;;  %v360_v0 = vcvt.f32.s32 %v644_v45 }
  0xf4   :  { %v709_v1 = vor.u32 %v331_v48, %v330_v57  ;;  %v353_v2 = vcvt.s32.f32 %v352_v58  ;;  %vm711_vm9 = vcmp.lt.f32.partialorder %v358_v60, 8388608.0  ;;  %v363_v4 = vand.u32 2147483648, %v644_v45 }
  0xf5   :  { %v716_v5 = vor.u32 %v339_v49, %v338_v61  ;;  %v718_v6 = vor.u32 %v347_v52, %v346_v62  ;;  %v361_v7 = vcvt.s32.f32 %v360_v0  ;;  %v366_v8 = vand.u32 2147483647, %v647_v46 }
  0xf6   :  { %v333_v9 = vsel %vm687_vm5, %v709_v1, %v632_v41  ;;  %v354_v10 = vand.u32 2147483647, %v353_v2  ;;  %v368_v11 = vcvt.f32.s32 %v647_v46  ;;  %v371_v12 = vand.u32 2147483648, %v647_v46 }
  0xf7   :  { %v341_v13 = vsel %vm691_vm6, %v716_v5, %v635_v42  ;;  %v349_v18 = vsel %vm696_vm7, %v718_v6, %v638_v43  ;;  %v362_v22 = vand.u32 2147483647, %v361_v7  ;;  %vm735_vm10 = vcmp.lt.f32.partialorder %v366_v8, 8388608.0 }
  0xf8   :  { %v739_v33 = vor.u32 %v355_v59, %v354_v10  ;;  %v369_v34 = vcvt.s32.f32 %v368_v11  ;;  %v374_v36 = vand.u32 2147483647, %v650_v47  ;;  %v376_v37 = vcvt.f32.s32 %v650_v47 }
  0xf9   :  { %v743_v38 = vor.u32 %v363_v4, %v362_v22  ;;  %v379_v39 = vand.u32 2147483648, %v650_v47  ;;  %v382_v40 = vand.u32 2147483647, %v653_v15  ;;  %v384_v26 = vcvt.f32.s32 %v653_v15 }
  0xfa   :  { %v357_v27 = vsel %vm704_vm8, %v739_v33, %v641_v44  ;;  %v370_v48 = vand.u32 2147483647, %v369_v34  ;;  %vm752_vm11 = vcmp.lt.f32.partialorder %v374_v36, 8388608.0  ;;  %v377_v29 = vcvt.s32.f32 %v376_v37 }
  0xfb   :  { %v365_v49 = vsel %vm711_vm9, %v743_v38, %v644_v45  ;;  %vm760_vm12 = vcmp.lt.f32.partialorder %v382_v40, 8388608.0  ;;  %v385_v31 = vcvt.s32.f32 %v384_v26  ;;  %v387_v35 = vand.u32 2147483648, %v653_v15 }
  0xfc   :  { %v765_v52 = vor.u32 %v371_v12, %v370_v48  ;;  %v378_v53 = vand.u32 2147483647, %v377_v29  ;;  %v390_v55 = vand.u32 2147483647, %v656_v16  ;;  %v392_v56 = vcvt.f32.s32 %v656_v16 }
  0xfd   :  { %v386_v57 = vand.u32 2147483647, %v385_v31  ;;  %v395_v58 = vand.u32 2147483648, %v656_v16  ;;  %v398_v59 = vand.u32 2147483647, %v659_v17  ;;  %v400_v60 = vcvt.f32.s32 %v659_v17 }
  0xfe   :  { %v373_v61 = vsel %vm735_vm10, %v765_v52, %v647_v46  ;;  %v776_v62 = vor.u32 %v379_v39, %v378_v53  ;;  %vm778_vm13 = vcmp.lt.f32.partialorder %v390_v55, 8388608.0  ;;  %v393_v2 = vcvt.s32.f32 %v392_v56 }
  0xff   :  { %v782_v4 = vor.u32 %v387_v35, %v386_v57  ;;  %vm784_vm14 = vcmp.lt.f32.partialorder %v398_v59, 8388608.0  ;;  %v401_v8 = vcvt.s32.f32 %v400_v60  ;;  %v403_v10 = vand.u32 2147483648, %v659_v17 }
 0x100   :  { %v381_v11 = vsel %vm752_vm11, %v776_v62, %v650_v47  ;;  %v394_v12 = vand.u32 2147483647, %v393_v2  ;;  %v406_v22 = vand.u32 2147483647, %v662_v19  ;;  %v408_v34 = vcvt.f32.s32 %v662_v19 }
 0x101   :  { %v389_v36 = vsel %vm760_vm12, %v782_v4, %v653_v15  ;;  %v402_v37 = vand.u32 2147483647, %v401_v8  ;;  %v411_v39 = vand.u32 2147483648, %v662_v19  ;;  %v414_v40 = vand.u32 2147483647, %v665_v20 }
 0x102   :  { %v396_v26 = vor.u32 %v395_v58, %v394_v12  ;;  %vm801_vm15 = vcmp.lt.f32.partialorder %v406_v22, 8388608.0  ;;  %v409_v47 = vcvt.s32.f32 %v408_v34  ;;  %v416_v28 = vcvt.f32.s32 %v665_v20 }
 0x103   :  { %v404_v29 = vor.u32 %v403_v10, %v402_v37  ;;  %vm806_vm0 = vcmp.lt.f32.partialorder %v414_v40, 8388608.0  ;;  %v419_v15 = vand.u32 2147483648, %v665_v20  ;;  %v422_v30 = vand.u32 2147483647, %v668_v21 }
 0x104   :  { %v397_v35 = vsel %vm778_vm13, %v396_v26, %v656_v16  ;;  %v410_v53 = vand.u32 2147483647, %v409_v47  ;;  %v417_v55 = vcvt.s32.f32 %v416_v28  ;;  %v424_v56 = vcvt.f32.s32 %v668_v21 }
 0x105   :  { %v405_v57 = vsel %vm784_vm14, %v404_v29, %v659_v17  ;;  %vm819_vm1 = vcmp.lt.f32.partialorder %v422_v30, 8388608.0  ;;  %v427_v59 = vand.u32 2147483648, %v668_v21  ;;  %v430_v60 = vand.u32 2147483647, %v671_v23 }
 0x106   :  { %v412_v62 = vor.u32 %v411_v39, %v410_v53  ;;  %v418_v2 = vand.u32 2147483647, %v417_v55  ;;  %v425_v0 = vcvt.s32.f32 %v424_v56  ;;  %v432_v16 = vcvt.f32.s32 %v671_v23 }
 0x107   :  { %vm826_vm2 = vcmp.lt.f32.partialorder %v430_v60, 8388608.0  ;;  %v435_v7 = vand.u32 2147483648, %v671_v23  ;;  %v438_v17 = vand.u32 2147483647, %v674_v24  ;;  %v440_v8 = vcvt.f32.s32 %v674_v24 }
 0x108   :  { %v413_v10 = vsel %vm801_vm15, %v412_v62, %v662_v19  ;;  %v420_v12 = vor.u32 %v419_v15, %v418_v2  ;;  %v426_v22 = vand.u32 2147483647, %v425_v0  ;;  %v433_v34 = vcvt.s32.f32 %v432_v16 }
 0x109   :  { %vm836_vm3 = vcmp.lt.f32.partialorder %v438_v17, 8388608.0  ;;  %v441_v39 = vcvt.s32.f32 %v440_v8  ;;  %v443_v40 = vand.u32 2147483648, %v674_v24  ;;  %v446_v26 = vand.u32 2147483647, %v677_v25 }
 0x10a   :  { %v421_v47 = vsel %vm806_vm0, %v420_v12, %v665_v20  ;;  %v428_v28 = vor.u32 %v427_v59, %v426_v22  ;;  %v434_v29 = vand.u32 2147483647, %v433_v34  ;;  %v448_v19 = vcvt.f32.s32 %v677_v25 }
 0x10b   :  { %v442_v48 = vand.u32 2147483647, %v441_v39  ;;  %vm846_vm4 = vcmp.lt.f32.partialorder %v446_v26, 8388608.0  ;;  %v451_v30 = vand.u32 2147483648, %v677_v25  ;;  %v175_v53 = vmax.f32 %v333_v9, -128.0 }
 0x10c   :  { %v429_v20 = vsel %vm819_vm1, %v428_v28, %v668_v21  ;;  %v436_v31 = vor.u32 %v435_v7, %v434_v29  ;;  %v449_v55 = vcvt.s32.f32 %v448_v19  ;;  %v176_v56 = vmax.f32 %v341_v13, -128.0 }
 0x10d   :  { %v444_v59 = vor.u32 %v443_v40, %v442_v48  ;;  %v177_v41 = vmax.f32 %v349_v18, -128.0  ;;  %v178_v21 = vmax.f32 %v357_v27, -128.0  ;;  %v179_v42 = vmax.f32 %v365_v49, -128.0 }
 0x10e   :  { %v437_v50 = vsel %vm826_vm2, %v436_v31, %v671_v23  ;;  %v450_v51 = vand.u32 2147483647, %v449_v55  ;;  %v180_v43 = vmax.f32 %v373_v61, -128.0  ;;  %v181_v54 = vmax.f32 %v381_v11, -128.0 }
 0x10f   :  { %v445_v44 = vsel %vm836_vm3, %v444_v59, %v674_v24  ;;  %v182_v63 = vmax.f32 %v389_v36, -128.0  ;;  %v183_v1 = vmax.f32 %v397_v35, -128.0  ;;  %v184_v45 = vmax.f32 %v405_v57, -128.0 }
 0x110   :  { %v452_v3 = vor.u32 %v451_v30, %v450_v51  ;;  %v185_v5 = vmax.f32 %v413_v10, -128.0  ;;  %v186_v6 = vmax.f32 %v421_v47, -128.0  ;;  %v187_v9 = vmax.f32 %v429_v20, -128.0 }
 0x111   :  { %v188_v23 = vmax.f32 %v437_v50, -128.0  ;;  %v189_v13 = vmax.f32 %v445_v44, -128.0  ;;  %v191_v18 = vmin.f32 %v175_v53, 127.0  ;;  %v192_v32 = vmin.f32 %v176_v56, 127.0 }
 0x112   :  { %v453_v46 = vsel %vm846_vm4, %v452_v3, %v677_v25  ;;  %v193_v33 = vmin.f32 %v177_v41, 127.0  ;;  %v194_v38 = vmin.f32 %v178_v21, 127.0  ;;  %v195_v27 = vmin.f32 %v179_v42, 127.0 }
 0x113   :  { %v190_v49 = vmax.f32 %v453_v46, -128.0  ;;  %v196_v24 = vmin.f32 %v180_v43, 127.0  ;;  %v197_v52 = vmin.f32 %v181_v54, 127.0  ;;  %v198_v61 = vmin.f32 %v182_v63, 127.0 }
 0x114   :  { %v199_v11 = vmin.f32 %v183_v1, 127.0  ;;  %v200_v36 = vmin.f32 %v184_v45, 127.0  ;;  %v201_v35 = vmin.f32 %v185_v5, 127.0  ;;  %v202_v57 = vmin.f32 %v186_v6, 127.0 }
 0x115   :  { %v203_v58 = vmin.f32 %v187_v9, 127.0  ;;  %v204_v60 = vmin.f32 %v188_v23, 127.0  ;;  %v205_v62 = vmin.f32 %v189_v13, 127.0  ;;  %v206_v2 = vmin.f32 %v190_v49, 127.0 }
 0x116   :  { %v207_v0 = vmul.f32 %v191_v18, %v624_v14  ;;  %v208_v16 = vmul.f32 %v192_v32, %v624_v14  ;;  %v209_v25 = vmul.f32 %v193_v33, %v624_v14  ;;  %v210_v4 = vmul.f32 %v194_v38, %v624_v14 }
 0x117   :  { %v211_v7 = vmul.f32 %v195_v27, %v624_v14  ;;  %v212_v17 = vmul.f32 %v196_v24, %v624_v14  ;;  %v213_v8 = vmul.f32 %v197_v52, %v624_v14  ;;  %v214_v10 = vmul.f32 %v198_v61, %v624_v14 }
 0x118   :  { %v215_v12 = vmul.f32 %v199_v11, %v624_v14  ;;  %v216_v22 = vmul.f32 %v200_v36, %v624_v14  ;;  %v217_v34 = vmul.f32 %v201_v35, %v624_v14  ;;  %v218_v37 = vmul.f32 %v202_v57, %v624_v14 }
 0x119   :  { %v219_v39 = vmul.f32 %v203_v58, %v624_v14  ;;  %v220_v40 = vmul.f32 %v204_v60, %v624_v14  ;;  %v278_v26 = vpack.c.bf16 %v208_v16, %v207_v0  ;;  %v283_v47 = vpack.c.bf16 %v210_v4, %v209_v25 }
 0x11a   :  { %v288_v28 = vpack.c.bf16 %v212_v17, %v211_v7  ;;  %v221_v29 = vmul.f32 %v205_v62, %v624_v14  ;;  %v222_v19 = vmul.f32 %v206_v2, %v624_v14  ;;  %v293_v48 = vpack.c.bf16 %v214_v10, %v213_v8 }
 0x11b   :  { %279 = vst [vmem:[#allocation7] sm:$0xff] %v278_v26   ;;  %v298_v15 = vpack.c.bf16 %v216_v22, %v215_v12  ;;  %v303_v30 = vpack.c.bf16 %v218_v37, %v217_v34  ;;  %v308_v53 = vpack.c.bf16 %v220_v40, %v219_v39 }
 0x11c   :  { %315 = vst [vmem:[#allocation7 + $0x8] sm:$0xff] %v283_v47   ;;  %v313_v20 = vpack.c.bf16 %v222_v19, %v221_v29 }
 0x11d   :  { %316 = vst [vmem:[#allocation7 + $0x10] sm:$0xff] %v288_v28  }
 0x11e   :  { %317 = vst [vmem:[#allocation7 + $0x18] sm:$0xff] %v293_v48  }
 0x11f   :  { %318 = vst [vmem:[#allocation7 + $0x20] sm:$0xff] %v298_v15  }
 0x120   :  { %319 = vst [vmem:[#allocation7 + $0x28] sm:$0xff] %v303_v30  }
 0x121   :  { %320 = vst [vmem:[#allocation7 + $0x30] sm:$0xff] %v308_v53  }
 0x122   :  { %321 = vst [vmem:[#allocation7 + $0x38] sm:$0xff] %v313_v20  }
 0x123   :  { %267 = dma.vmem_to_hbm [thread:$0]  %s260_s25, 1024, %s262_s28, [#allocation4], %s553_s29, %s553_s29, %s554_s30  }
 0x124   :  { %544 = dma.done.wait [#allocation4], 1024  }
 0x125   :  { %545 = vsyncadd [#allocation4], 4294966272 }
 0x126   :  { %272 = vsyncpa [#allocation3], 1 }
 0x127   :  { %273 = vsyncpa [#allocation6], 1 }
 0x128   :  { %274 = vsyncpa [#allocation4], 1 }

</bundles_post_ra>
